<compile_context>
chip_gen: v7x
topology: tpu7x:2x2x1
jax: 0.10.0
libtpu: 0.0.40
codegen_flags: <defaults>
</compile_context>

<pallas_src>
import functools

import jax
import jax.numpy as jnp
from jax.experimental import pallas as pl
from jax.experimental.pallas import tpu as pltpu


def _focal_kernel(x_ref, t_ref, a_ref, out_ref, acc_ref, *, gamma, hw, tl, ragged):
    j = pl.program_id(1)

    @pl.when(j == 0)
    def _():
        acc_ref[...] = jnp.zeros_like(acc_ref)

    x = x_ref[0].astype(jnp.float32)            # (C, TL): classes on sublanes
    t = t_ref[0].astype(jnp.int32)              # (1, TL): widened in-kernel

    # log-softmax pieces along the class (sublane) axis.
    m = jnp.max(x, axis=0, keepdims=True)       # (1, TL)
    z = x - m                                   # (C, TL)
    ez = jnp.exp(z)                             # (C, TL)  (only exp in the kernel)
    sumexp = jnp.sum(ez, axis=0, keepdims=True)  # (1, TL)

    # Masked selects at the target class (no float one-hot multiplies).
    row = jax.lax.broadcasted_iota(jnp.int32, z.shape, 0)                # (C, TL)
    hit = row == t                                                       # (C, TL)
    z_t = jnp.sum(jnp.where(hit, z, 0.0), axis=0, keepdims=True)         # (1, TL)
    ez_t = jnp.sum(jnp.where(hit, ez, 0.0), axis=0, keepdims=True)       # (1, TL)
    at = jnp.sum(jnp.where(hit, a_ref[0], 0.0), axis=0, keepdims=True)   # (1, TL)

    logpt = z_t - jnp.log(sumexp)               # (1, TL)
    pt = ez_t / sumexp                          # softmax[target]; no second exp

    one_minus_pt = jnp.maximum(1.0 - pt, 0.0)
    g = float(gamma)
    if g == 0.0:
        focal = None                            # (1 - pt)**0 == 1, skip
    elif g.is_integer() and g > 0:
        focal = one_minus_pt
        for _ in range(int(g) - 1):             # repeated multiply, no pow
            focal = focal * one_minus_pt
    else:
        focal = jnp.power(jnp.maximum(one_minus_pt, 1e-30), jnp.float32(g))

    contrib = logpt * at if focal is None else focal * logpt * at       # (1, TL)

    if ragged:
        # Only the final (partial) spatial tile needs masking, and only the
        # contribution: every reduction above is per-column.
        col = j * tl + jax.lax.broadcasted_iota(jnp.int32, contrib.shape, 1)
        contrib = jnp.where(col < hw, contrib, 0.0)

    acc_ref[...] += contrib                     # per-lane partials (pure VPU add)

    @pl.when(j == pl.num_programs(1) - 1)
    def _():
        total = jnp.sum(acc_ref[...], axis=1, keepdims=True)   # (1, 1)
        # 128-lane-dense (unmasked) store of this batch row's partial sum.
        out_ref[0] = jnp.broadcast_to(total, (1, 128))


def _sublane_pad(rows, itemsize):
    mult = {4: 8, 2: 16, 1: 32}.get(int(itemsize), 8)
    return ((rows + mult - 1) // mult) * mult


def _pick_tile(hw, c, x_itemsize, t_itemsize):
    """Largest lane-aligned spatial tile whose sublane-PADDED working set
    (double-buffered logits + targets, f32 accumulator) fits the VMEM budget."""
    budget = 4 * 1024 * 1024                 # safe on v7x (64 MiB VMEM, 32 MiB scoped)
    try:
        if pltpu.get_tpu_info().vmem_capacity_bytes >= 100 * 1024 * 1024:
            budget = 8 * 1024 * 1024         # v5e / v6e: 128 MiB VMEM
    except Exception:
        pass
    bytes_per_lane = (2 * _sublane_pad(c, x_itemsize) * x_itemsize     # logits x2 bufs
                      + 2 * _sublane_pad(1, t_itemsize) * t_itemsize   # targets x2 bufs
                      + 8 * 4)                                         # f32 accumulator
    max_cols = (budget // bytes_per_lane) // 128 * 128
    max_cols = max(128, min(max_cols, 8192))  # >=512 lanes amortizes grid overhead
    if hw <= max_cols:
        return int(hw)                        # full-extent block (always legal)
    return int(max_cols)                      # multiple of 128; ragged tail masked


def focal_loss(logits, target, *, gamma=0.0, alpha=None, size_average=True,
               tile_cols=None):
    """Pallas FocalLoss forward.

    logits: (N, C, H, W) (or (M, C)) float logits (f32 or bf16, kept as-is for DMA).
    target: (N, H, W) (or (M,)) integer class indices.
    alpha:  None, float, or list of per-class weights (like the PyTorch module).
    """
    x = jnp.asarray(logits)
    t = jnp.asarray(target)

    if x.ndim > 2:
        n, c = int(x.shape[0]), int(x.shape[1])
        hw = 1
        for d in x.shape[2:]:
            hw *= int(d)
        x3 = x.reshape(n, c, hw)                 # free view of NCHW: no transpose
        t_flat = t.reshape(n, 1, hw)
    else:
        # TODO(synk): the (M, C) path still materializes a transposed HBM copy;
        # a lane-major kernel variant (M on lanes, softmax along lanes) would
        # avoid the extra HBM pass.
        mrows, c = int(x.shape[0]), int(x.shape[1])
        n, hw = 1, mrows
        x3 = x.T.reshape(1, c, hw)
        t_flat = t.reshape(1, 1, hw)

    # Narrow the target stream in HBM (int8 when class ids fit); widened to
    # int32 inside the kernel.  ~4x less target HBM traffic (matters on v5e).
    t_dtype = jnp.int8 if c <= 127 else jnp.int32
    t3 = t_flat.astype(t_dtype)

    # alpha handling mirrors the module __init__ / forward.
    # NOTE: float alpha with C > 2 (padded with ones) and out-of-range targets
    # (contribute 0) are silently tolerated here; PyTorch would raise on gather.
    if alpha is None:
        alpha_vec = jnp.ones((c,), dtype=jnp.float32)
    elif isinstance(alpha, (float, int)):
        alpha_vec = jnp.array([float(alpha), 1.0 - float(alpha)], dtype=jnp.float32)
    else:
        alpha_vec = jnp.asarray(alpha, dtype=jnp.float32)
    if alpha_vec.shape[0] < c:
        alpha_vec = jnp.concatenate(
            [alpha_vec, jnp.ones((c - alpha_vec.shape[0],), jnp.float32)])
    alpha_vec = alpha_vec[:c].reshape(1, c, 1)

    tl = tile_cols if tile_cols is not None else _pick_tile(
        hw, c, x3.dtype.itemsize, t3.dtype.itemsize)
    grid = (n, pl.cdiv(hw, tl))
    ragged = (hw % tl) != 0
    n_total = n * hw

    kernel = functools.partial(_focal_kernel, gamma=float(gamma), hw=hw, tl=tl,
                               ragged=ragged)

    cost = pl.CostEstimate(
        flops=int(12 * n_total * c),
        transcendentals=int(n_total * (c + 1)),
        bytes_accessed=int(n_total * c * x3.dtype.itemsize
                           + n_total * t3.dtype.itemsize + 4 * c + 4 * n * 128),
    )

    partials = pl.pallas_call(
        kernel,
        out_shape=jax.ShapeDtypeStruct((n, 1, 128), jnp.float32),
        grid_spec=pltpu.PrefetchScalarGridSpec(
            num_scalar_prefetch=0,
            grid=grid,
            in_specs=[
                pl.BlockSpec((1, c, tl), lambda ni, j: (ni, 0, j)),   # logits tile
                pl.BlockSpec((1, 1, tl), lambda ni, j: (ni, 0, j)),   # target tile
                pl.BlockSpec((1, c, 1), lambda ni, j: (0, 0, 0)),     # alpha (replicated)
            ],
            out_specs=pl.BlockSpec((1, 1, 128), lambda ni, j: (ni, 0, 0)),
            scratch_shapes=[pltpu.VMEM((1, tl), jnp.float32)],        # per-lane partials
        ),
        compiler_params=pltpu.CompilerParams(
            # Batch rows are fully independent -> megacore-shardable on v7x;
            # the spatial axis carries the accumulator -> "arbitrary".
            dimension_semantics=("parallel", "arbitrary"),
            vmem_limit_bytes=32 * 1024 * 1024,
        ),
        cost_estimate=cost,
    )(x3, t3, alpha_vec)

    # Tiny epilogue in plain JAX: per-row partials -> scalar loss.
    total = jnp.sum(partials[:, 0, 0], dtype=jnp.float32)
    loss = -total
    if size_average:
        loss = loss / jnp.float32(n_total)
    return loss


def _reference_focal_loss(logits_nchw, target_nhw, gamma, alpha, size_average):
    x = jnp.asarray(logits_nchw)
    n, c = x.shape[0], x.shape[1]
    x = x.reshape(n, c, -1).transpose(0, 2, 1).reshape(-1, c)
    t = jnp.asarray(target_nhw).reshape(-1)
    logp = jax.nn.log_softmax(x, axis=-1)
    logpt = jnp.take_along_axis(logp, t[:, None], axis=1)[:, 0]
    pt = jnp.exp(logpt)
    if alpha is not None:
        a = jnp.asarray(alpha, dtype=x.dtype)
        logpt = logpt * a[t]
    loss = -1.0 * (1.0 - pt) ** gamma * logpt
    return loss.mean() if size_average else loss.sum()


if __name__ == "__main__":
    key = jax.random.PRNGKey(0)
    k1, k2 = jax.random.split(key)

    N, C, H, W = 2, 4, 16, 16
    logits = jax.random.normal(k1, (N, C, H, W), dtype=jnp.float32)
    target = jax.random.randint(k2, (N, H, W), 0, C, dtype=jnp.int32)

    gamma = 2.0
    alpha = [0.25, 0.75, 0.5, 1.0]   # per-class weights (len == C)
    size_average = True

    out = focal_loss(logits, target, gamma=gamma, alpha=alpha,
                     size_average=size_average)
    out = jax.block_until_ready(out)

    ref = _reference_focal_loss(logits, target, gamma, alpha, size_average)
    assert jnp.allclose(out, ref, rtol=1e-5, atol=1e-5), (out, ref)

    print("KERNEL_OK")
</pallas_src>

<mosaic_0001>
module attributes {stable_mosaic.version = 11 : i64} {
  func.func @_focal_kernel(%arg0: i32, %arg1: i32, %arg2: memref<1x4x256xf32, #tpu.memory_space<vmem>>, %arg3: memref<1x1x256xi8, #tpu.memory_space<vmem>>, %arg4: memref<1x4x1xf32, #tpu.memory_space<vmem>>, %arg5: memref<1x1x128xf32, #tpu.memory_space<vmem>>, %arg6: memref<1x256xf32, #tpu.memory_space<vmem>>) attributes {dimension_semantics = [#tpu.dimension_semantics<parallel>, #tpu.dimension_semantics<arbitrary>], iteration_bounds = array<i64: 2, 1>, scalar_prefetch = 0 : i64, scratch_operands = 1 : i64, tpu.core_type = #tpu.core_type<tc>, window_params = [{transform_indices = @transform_0, window_bounds = array<i64: 1, 4, 256>}, {transform_indices = @transform_1, window_bounds = array<i64: 1, 1, 256>}, {pipeline_mode = #tpu.pipeline_mode<synchronous>, transform_indices = @transform_2, window_bounds = array<i64: 1, 4, 1>}, {transform_indices = @transform_3, window_bounds = array<i64: 1, 1, 128>}]} {
    %c0_i32 = arith.constant 0 : i32
    %0 = arith.cmpi eq, %arg1, %c0_i32 : i32
    %1 = arith.extui %0 : i1 to i32
    %c0_i32_0 = arith.constant 0 : i32
    %2 = arith.cmpi ne, %1, %c0_i32_0 : i32
    scf.if %2 {
      %cst_24 = arith.constant 0.000000e+00 : f32
      %50 = vector.broadcast %cst_24 : f32 to vector<1x256xf32>
      %c0_25 = arith.constant 0 : index
      %c0_26 = arith.constant 0 : index
      %51 = vector.load %arg6[%c0_25, %c0_26] : memref<1x256xf32, #tpu.memory_space<vmem>>, vector<1x256xf32>
      tpu.vector_store %arg6[%c0_25, %c0_26], %50 {strides = array<i32>} : memref<1x256xf32, #tpu.memory_space<vmem>>, vector<1x256xf32>,
    } else {
    }
    %c0 = arith.constant 0 : index
    %c0_1 = arith.constant 0 : index
    %c0_2 = arith.constant 0 : index
    %3 = vector.load %arg2[%c0, %c0_1, %c0_2] : memref<1x4x256xf32, #tpu.memory_space<vmem>>, vector<1x4x256xf32>
    %4 = vector.shape_cast %3 : vector<1x4x256xf32> to vector<4x256xf32>
    %c0_3 = arith.constant 0 : index
    %c0_4 = arith.constant 0 : index
    %c0_5 = arith.constant 0 : index
    %5 = vector.load %arg3[%c0_3, %c0_4, %c0_5] : memref<1x1x256xi8, #tpu.memory_space<vmem>>, vector<1x1x256xi8>
    %6 = vector.shape_cast %5 : vector<1x1x256xi8> to vector<1x256xi8>
    %7 = arith.extsi %6 : vector<1x256xi8> to vector<1x256xi32>
    %cst = arith.constant dense<0xFF800000> : vector<256xf32>
    %8 = vector.multi_reduction <maximumf>, %4, %cst [0] : vector<4x256xf32> to vector<256xf32>
    %9 = vector.shape_cast %8 : vector<256xf32> to vector<1x256xf32>
    %10 = vector.broadcast %9 : vector<1x256xf32> to vector<4x256xf32>
    %11 = arith.subf %4, %10 : vector<4x256xf32>
    %12 = math.exp %11 : vector<4x256xf32>
    %cst_6 = arith.constant dense<0.000000e+00> : vector<256xf32>
    %13 = vector.multi_reduction <add>, %12, %cst_6 [0] : vector<4x256xf32> to vector<256xf32>
    %14 = vector.shape_cast %13 : vector<256xf32> to vector<1x256xf32>
    %15 = tpu.iota {dimensions = array<i32: 0>} : vector<4x256xi32>
    %16 = vector.broadcast %7 : vector<1x256xi32> to vector<4x256xi32>
    %17 = arith.cmpi eq, %15, %16 : vector<4x256xi32>
    %cst_7 = arith.constant 0.000000e+00 : f32
    %18 = vector.broadcast %cst_7 : f32 to vector<4x256xf32>
    %19 = arith.select %17, %11, %18 : vector<4x256xi1>, vector<4x256xf32>
    %cst_8 = arith.constant dense<0.000000e+00> : vector<256xf32>
    %20 = vector.multi_reduction <add>, %19, %cst_8 [0] : vector<4x256xf32> to vector<256xf32>
    %21 = vector.shape_cast %20 : vector<256xf32> to vector<1x256xf32>
    %cst_9 = arith.constant 0.000000e+00 : f32
    %22 = vector.broadcast %cst_9 : f32 to vector<4x256xf32>
    %23 = arith.select %17, %12, %22 : vector<4x256xi1>, vector<4x256xf32>
    %cst_10 = arith.constant dense<0.000000e+00> : vector<256xf32>
    %24 = vector.multi_reduction <add>, %23, %cst_10 [0] : vector<4x256xf32> to vector<256xf32>
    %25 = vector.shape_cast %24 : vector<256xf32> to vector<1x256xf32>
    %c0_11 = arith.constant 0 : index
    %c0_12 = arith.constant 0 : index
    %c0_13 = arith.constant 0 : index
    %26 = vector.load %arg4[%c0_11, %c0_12, %c0_13] : memref<1x4x1xf32, #tpu.memory_space<vmem>>, vector<1x4x1xf32>
    %27 = vector.shape_cast %26 : vector<1x4x1xf32> to vector<4x1xf32>
    %cst_14 = arith.constant 0.000000e+00 : f32
    %28 = vector.shape_cast %27 : vector<4x1xf32> to vector<4x1xf32>
    %29 = vector.broadcast %28 : vector<4x1xf32> to vector<4x256xf32>
    %30 = vector.broadcast %cst_14 : f32 to vector<4x256xf32>
    %31 = arith.select %17, %29, %30 : vector<4x256xi1>, vector<4x256xf32>
    %cst_15 = arith.constant dense<0.000000e+00> : vector<256xf32>
    %32 = vector.multi_reduction <add>, %31, %cst_15 [0] : vector<4x256xf32> to vector<256xf32>
    %33 = vector.shape_cast %32 : vector<256xf32> to vector<1x256xf32>
    %34 = math.log %14 : vector<1x256xf32>
    %35 = arith.subf %21, %34 : vector<1x256xf32>
    %36 = arith.divf %25, %14 : vector<1x256xf32>
    %cst_16 = arith.constant 1.000000e+00 : f32
    %37 = vector.broadcast %cst_16 : f32 to vector<1x256xf32>
    %38 = arith.subf %37, %36 : vector<1x256xf32>
    %cst_17 = arith.constant 0.000000e+00 : f32
    %39 = vector.broadcast %cst_17 : f32 to vector<1x256xf32>
    %40 = arith.maximumf %38, %39 : vector<1x256xf32>
    %41 = arith.mulf %40, %40 : vector<1x256xf32>
    %42 = arith.mulf %41, %35 : vector<1x256xf32>
    %43 = arith.mulf %42, %33 : vector<1x256xf32>
    %c0_18 = arith.constant 0 : index
    %c0_19 = arith.constant 0 : index
    %44 = vector.load %arg6[%c0_18, %c0_19] : memref<1x256xf32, #tpu.memory_space<vmem>>, vector<1x256xf32>
    %45 = arith.addf %44, %43 : vector<1x256xf32>
    %c0_20 = arith.constant 0 : index
    %c0_21 = arith.constant 0 : index
    %46 = vector.load %arg6[%c0_20, %c0_21] : memref<1x256xf32, #tpu.memory_space<vmem>>, vector<1x256xf32>
    tpu.vector_store %arg6[%c0_20, %c0_21], %45 {strides = array<i32>} : memref<1x256xf32, #tpu.memory_space<vmem>>, vector<1x256xf32>,
    %c0_i32_22 = arith.constant 0 : i32
    %47 = arith.cmpi eq, %arg1, %c0_i32_22 : i32
    %48 = arith.extui %47 : i1 to i32
    %c0_i32_23 = arith.constant 0 : i32
    %49 = arith.cmpi ne, %48, %c0_i32_23 : i32
    scf.if %49 {
      %c0_24 = arith.constant 0 : index
      %c0_25 = arith.constant 0 : index
      %50 = vector.load %arg6[%c0_24, %c0_25] : memref<1x256xf32, #tpu.memory_space<vmem>>, vector<1x256xf32>
      %cst_26 = arith.constant dense<0.000000e+00> : vector<1xf32>
      %51 = vector.multi_reduction <add>, %50, %cst_26 [1] : vector<1x256xf32> to vector<1xf32>
      %52 = vector.shape_cast %51 : vector<1xf32> to vector<1x1xf32>
      %53 = vector.shape_cast %52 : vector<1x1xf32> to vector<1x1xf32>
      %54 = vector.broadcast %53 : vector<1x1xf32> to vector<1x128xf32>
      %c0_27 = arith.constant 0 : index
      %c0_28 = arith.constant 0 : index
      %c0_29 = arith.constant 0 : index
      %55 = vector.load %arg5[%c0_27, %c0_28, %c0_29] : memref<1x1x128xf32, #tpu.memory_space<vmem>>, vector<1x1x128xf32>
      %56 = vector.shape_cast %55 : vector<1x1x128xf32> to vector<1x128xf32>
      %57 = vector.shape_cast %54 : vector<1x128xf32> to vector<1x1x128xf32>
      tpu.vector_store %arg5[%c0_27, %c0_28, %c0_29], %57 {strides = array<i32>} : memref<1x1x128xf32, #tpu.memory_space<vmem>>, vector<1x1x128xf32>,
    } else {
    }
    return
  }
  func.func @transform_0(%arg0: i32, %arg1: i32) -> (i32, i32, i32) {
    %c0_i32 = arith.constant 0 : i32
    %c0_i32_0 = arith.constant 0 : i32
    return %arg0, %c0_i32, %arg1 : i32, i32, i32
  }
  func.func @transform_1(%arg0: i32, %arg1: i32) -> (i32, i32, i32) {
    %c0_i32 = arith.constant 0 : i32
    %c0_i32_0 = arith.constant 0 : i32
    return %arg0, %c0_i32, %arg1 : i32, i32, i32
  }
  func.func @transform_2(%arg0: i32, %arg1: i32) -> (i32, i32, i32) {
    %c0_i32 = arith.constant 0 : i32
    %c0_i32_0 = arith.constant 0 : i32
    %c0_i32_1 = arith.constant 0 : i32
    %c0_i32_2 = arith.constant 0 : i32
    return %c0_i32, %c0_i32_0, %c0_i32_1 : i32, i32, i32
  }
  func.func @transform_3(%arg0: i32, %arg1: i32) -> (i32, i32, i32) {
    %c0_i32 = arith.constant 0 : i32
    %c0_i32_0 = arith.constant 0 : i32
    %c0_i32_1 = arith.constant 0 : i32
    return %arg0, %c0_i32, %c0_i32_0 : i32, i32, i32
  }
}

</mosaic_0001>

<bundles_post_ra>
// kernel: tpu_custom_call.1
= control target key start
LH: loop header
LB: loop body
LE: loop exit
PB: predicated region body
PF: predicated region fallthrough
CT: control target
= control target key end

     0   :  { %8 = vsyncpa [#allocation4], 0  ;;  %s1002_s0 = inlined_call_operand.hbm [shape: f32[2,4,256], index: 0, kind: input, shape index: {}]   ;;  %s1003_s1 = inlined_call_operand.vmem [shape: s8[2,1,256], index: 1, kind: input, shape index: {}]   ;;  %s1004_s2 = inlined_call_operand.vmem [shape: f32[1,4,1], index: 2, kind: input, shape index: {}]   ;;  %s1005_s3 = inlined_call_operand.hbm [shape: f32[2,1,128], index: 3, kind: output, shape index: {}]  }
   0x1   :  { %10 = vsyncpa [#allocation4 + $0x1], 0 }
   0x2   :  { %11 = vsyncpa [#allocation5], 0 }
   0x3   :  { %13 = vsyncpa [#allocation5 + $0x1], 0  ;;  %s769_s12 = smov 0   ;;  %s771_s13 = smov 0  }
   0x4   :  { %s773_s14 = smov 0   ;;  %s775_s15 = smov 0  }
   0x5   :  { %s777_s16 = smov 0   ;;  %s779_s17 = smov 0  }
   0x6 LB: > { %s539_s18 = sadd.s32 4294967295, %s742_s17   ;;  %s540_s19 = sadd.s32 4294967294, %s742_s17   ;;  %s742_s17 = sphi %s779_s17, %s19_s17   ;;  %s738_s16 = sphi %s777_s16, %s1027_s16   ;;  %s734_s15 = sphi %s775_s15, %s1026_s15   ;;  %s730_s14 = sphi %s773_s14, %s1025_s14   ;;  %s726_s13 = sphi %s771_s13, %s1024_s13   ;;  %s722_s12 = sphi %s769_s12, %s1023_s12  }
   0x7   : > { %s31_s20 = sadd.s32 1, %s738_s16  ;;  %s40_s21 = sadd.s32 1, %s730_s14 }
   0x8   : > { %p33_p0 = scmp.ge.s32.totalorder %s31_s20, 2  ;;  %p47_p1 = scmp.ne.s32.totalorder %s730_s14, %s726_s13 }
   0x9   : > { %p48_p2 = scmp.eq.s32.totalorder %s742_s17, 0  ;;  %p53_p3 = scmp.ne.s32.totalorder %s726_s13, %s722_s12 }
   0xa   : > { %s1029_s20 = smov (%p33_p0, %s31_s20), 0  ;;  %p54_p5 = scmp.eq.s32.totalorder %s539_s18, 0 }
   0xb   : > { %p810_p4 = por %p48_p2, %p47_p1  ;;  %s35_s23 = ssub.s32 %s738_s16, %s1029_s20 }
   0xc   : > { %p126_p6 = scmp.eq.s32.totalorder %s539_s18, 1  ;;  %p38_p7 = scmp.eq.s32.totalorder %s35_s23, 0 }
   0xd   : > { %p816_p8 = por %p54_p5, %p53_p3  ;;  %p132_p10 = scmp.eq.s32.totalorder %s540_s19, 1 }
   0xe   : > { %p820_p9 = por %p126_p6, %p47_p1  ;;  %p565_p13 = scmp.lt.s32.totalorder %s742_s17, 2 }
   0xf   : > { %s825_s26 = scalar_select %p38_p7, %s730_s14, %s40_s21  }
  0x10   : > { %s1009_s25 = scalar_select %p820_p9, 1, 0 }
  0x11   : > { %p827_p11 = por %p132_p10, %p53_p3  ;;  %s155_s28 = sand.u32 1, %s730_s14  }
  0x12   : > { %s543_s29 = sshll.u32 %s155_s28, 3  ;;  %s552_s30 = sshll.u32 %s738_s16, 7 }
  0x13   : > { %s1010_s27 = scalar_select %p827_p11, 1, 0 }
  0x14   : > { %s838_s6 = scalar_lea.hbm %s1002_s0, %s552_s30  ;;  %s159_s7 = scalar_lea.vmem [#allocation3], %s543_s29 }
  0x15   : > { %s169_s8 = sshll.u32 %s159_s7, 4  ;;  %p844_p0 = pnand %p565_p13, %p810_p4  ;;  %s840_s8 = int_to_ptr.vmem [resolvable:$true] %s169_s8 }
  0x16   : > { %s156_s10 = scalar_lea.sflag [#allocation4], %s155_s28  ;;  %s630_s11 = scalar_lea.hbm %s838_s6, 128 }
  0x17   : > { %p631_p3 = scmp.ne.s32.totalorder %s838_s6, %s630_s11  ;;  %p632_p5 = pneg %p844_p0 }
  0x18   : > { %s635_s21 = scalar_lea.hbm %s1002_s0, 256  ;;  %p636_p4 = scmp.lt.u32.totalorder %s838_s6, %s1002_s0 }
  0x19   : > { %p633_p6 = pnand %p632_p5, %p631_p3  ;;  %p637_p10 = scmp.lt.u32.totalorder %s635_s21, %s630_s11 }
  0x1a   : > { %p639_p12 = scmp.lt.u32.totalorder %s630_s11, %s838_s6 }
  0x1b   : > { %p634_p7 = pneg %p633_p6  ;;  %p638_p13 = por %p637_p10, %p636_p4 }
  0x1d   : > { %p640_p1 = por %p639_p12, %p638_p13 }
  0x1f   : > { %p641_p2 = pnand %p640_p1, %p634_p7 }
  0x21   : > { %644 = shalt.err (!%p641_p2)
}
  0x22   : > { %s645_s28 = scalar_lea.vmem %s840_s8, 128  ;;  %s744_s29 = smov [#allocation3]  }
  0x23   : > { %p646_p3 = scmp.ne.s32.totalorder %s840_s8, %s645_s28  ;;  %s650_s30 = sshll.u32 %s744_s29, 4  ;;  %s651_s30 = int_to_ptr.vmem [resolvable:$false] %s650_s30 }
  0x24   : > { %s652_s4 = scalar_lea.vmem %s651_s30, 256  ;;  %p653_p9 = scmp.lt.s32.totalorder %s840_s8, %s651_s30 }
  0x25   : > { %p648_p6 = pnand %p646_p3, %p632_p5  ;;  %p654_p4 = scmp.lt.s32.totalorder %s652_s4, %s645_s28 }
  0x27   : > { %p649_p11 = pneg %p648_p6  ;;  %p655_p10 = por %p654_p4, %p653_p9 }
  0x29   : > { %p656_p12 = pnand %p655_p10, %p649_p11 }
  0x2b   : > { %659 = shalt.err (!%p656_p12)
}
  0x2c   : > { %560 = dma.hbm_to_vmem [thread:$0]  (!%p844_p0), %s838_s6, 128, %s840_s8, %s156_s10  }
  0x2d   : > { %p1012_p1 = scmp.lt.s32.totalorder %s742_s17, 3  ;;  %p1013_p2 = scmp.ge.s32.totalorder %s742_s17, 1 }
  0x2f   : > { %p187_p5 = pnand %p1013_p2, %p1012_p1 }
  0x30   : > { %s880_s5 = sand.u32 (!%p187_p5), 1, %s726_s13  }
  0x31   : > { %190 = sbr.rel (%p187_p5) target bundleno = 380 (0x17c), region = 32  ;;  %s547_s7 = sshll.u32 (!%p187_p5), %s880_s5, 3 }
  0x32   : > { %s193_s11 = scalar_lea.sflag (!%p187_p5), [#allocation4], %s880_s5  ;;  %s196_s18 = scalar_lea.vmem (!%p187_p5), [#allocation3], %s547_s7 }
  0x38   : > { %713 = dma.done.wait (%p816_p8), %s193_s11, 128  }
  0x39   : > { %715 = vsyncadd (%p816_p8), %s193_s11, 4294967168  ;;  %v240_v0 = vlaneseq  ;;  %v745_v1 = vmov 0   ;;  %v746_v3 = vmov 0.0   ;;  %v345_v4 = vld [vmem:[%s1004_s2] sm:$0xf]  ;;  %vm251_vm1 = vcmask 1043456  }
  0x3a   : > { %618 = vset.pattern.permute.xlu0 %v745_v1  ;;  %v245_v5 = vld [vmem:[%s196_s18] sm:$0xff]  ;;  %p228_p8 = scmp.lt.s32.totalorder %s734_s15, 1  ;;  %vm427_vm4 = vcmask 1040384   ;;  %s225_s22 = scalar_lea.vmem [#allocation6], %s880_s5 }
  0x3b   : > { %vm888_vm0 = vcmp.lt.s32.totalorder %v240_v0, 256  ;;  %348 = vperm.xlu0 %618, %v345_v4   ;;  %v249_v6 = vcombine.high %v245_v5, %v245_v5  ;;  %v252_v7 = vsel %vm251_vm1, %v245_v5, -inf  ;;  %v904_v24 = vshrl.u32 %v240_v0, 7  ;;  %s447_s23 = sshll.u32 %s225_s22, 4  ;;  %s549_s28 = sshll.u32 %s734_s15, 4  ;;  %s950_s23 = int_to_ptr.vmem [resolvable:$true] %s447_s23 }
  0x3c   : > { %244 = vst.msk [vmem:[#allocation2] sm:$0x3] %vm888_vm0, %v746_v3  ;;  %v253_v9 = vrot.slane %v252_v7, 4  ;;  %s229_s24 = scalar_select %p228_p8, %s734_s15, 1 }
  0x3d   : > { %v259_v8 = vsel %vm251_vm1, %v249_v6, -inf  ;;  %v907_v27 = vsub.s32 0, %v904_v24  ;;  %v298_v28 = vsub.s32 4, %v904_v24  ;;  %s955_s4 = scalar_lea.hbm %s1005_s3, %s549_s28  ;;  %s435_s7 = scalar_lea.sflag [#allocation5], %s880_s5 }
  0x3e   : > { %v260_v10 = vrot.slane %v259_v8, 4  ;;  %v254_v11 = vmax.f32 %v252_v7, %v253_v9  ;;  %s548_s9 = sshll.u32 %s229_s24, 1  ;;  %s660_s11 = scalar_lea.vmem %s950_s23, 16 }
  0x3f   : > { %s234_s21 = scalar_lea.vmem %s1003_s1, %s548_s9  ;;  %p661_p9 = scmp.ne.s32.totalorder %s950_s23, %s660_s11 }
  0x40   : > { %v261_v12 = vmax.f32 %v259_v8, %v260_v10  ;;  %v255_v13 = vrot.slane %v254_v11, 2  ;;  %v246_v25 = vld [vmem:[%s234_s21] sm:$0x3]  ;;  %p1020_p11 = scmp.ne.s32.totalorder %s1009_s25, 0  ;;  %s748_s18 = smov [#allocation6]  }
  0x41   : > { %v247_v29 = vunpack.c.0.s8 %v246_v25  ;;  %s664_s15 = sshll.u32 %s748_s18, 4  ;;  %s665_s15 = int_to_ptr.vmem [resolvable:$false] %s664_s15 }
  0x42   : > { %v262_v14 = vrot.slane %v261_v12, 2  ;;  %v256_v15 = vmax.f32 %v254_v11, %v255_v13  ;;  %p662_p0 = pnand %p661_p9, %p1020_p11  ;;  %s666_s6 = scalar_lea.vmem %s665_s15, 32 }
  0x43   : > { %v295_v32 = vrot.slane %v247_v29, %v907_v27  ;;  %v299_v33 = vrot.slane %v247_v29, %v298_v28  ;;  %p667_p13 = scmp.lt.s32.totalorder %s950_s23, %s665_s15  ;;  %p668_p3 = scmp.lt.s32.totalorder %s666_s6, %s660_s11 }
  0x44   : > { %v263_v16 = vmax.f32 %v261_v12, %v262_v14  ;;  %v257_v17 = vrot.slane %v256_v15, 1  ;;  %p663_p7 = pneg %p662_p0 }
  0x45   : > { %v303_v37 = vrot.slane %v295_v32, %v907_v27  ;;  %v307_v38 = vrot.slane %v299_v33, %v907_v27  ;;  %p669_p6 = por %p668_p3, %p667_p13 }
  0x46   : > { %v264_v18 = vrot.slane %v263_v16, 1  ;;  %v258_v19 = vmax.f32 %v256_v15, %v257_v17 }
  0x47   : > { %vm916_vm2 = vcmp.eq.s32.totalorder %v904_v24, %v303_v37  ;;  %vm921_vm3 = vcmp.eq.s32.totalorder %v904_v24, %v307_v38  ;;  %p670_p4 = pnand %p669_p6, %p663_p7 }
  0x48   : > { %v265_v20 = vmax.f32 %v263_v16, %v264_v18 }
  0x4a   : > { %v268_v21 = vcombine.low %v258_v19, %v265_v20 }
  0x4c   : > { %v270_v22 = vsub.f32 %v245_v5, %v268_v21 }
  0x4e   : > { %v271_v23 = vmul.f32 1.442695, %v270_v22  ;;  %v311_v51 = vcombine.high %v270_v22, %v270_v22  ;;  %v313_v56 = vsel %vm916_vm2, %v270_v22, 0.0 }
  0x4f   : > { %v315_v62 = vsel %vm251_vm1, %v313_v56, 0.0 }
  0x50   : > { %620 = vpow2.f32 %v271_v23  ;;  %v314_v57 = vsel %vm921_vm3, %v311_v51, 0.0  ;;  %v316_v3 = vrot.slane %v315_v62, 4 }
  0x51   : > { %v322_v63 = vsel %vm251_vm1, %v314_v57, 0.0 }
  0x52   : > { %v323_v4 = vrot.slane %v322_v63, 4  ;;  %v317_v7 = vadd.f32 %v316_v3, %v315_v62  ;;  %v387_v3 = vld [vmem:[#allocation2] sm:$0x3] }
  0x54   : > { %v324_v8 = vadd.f32 %v323_v4, %v322_v63  ;;  %v318_v11 = vrot.slane %v317_v7, 2 }
  0x56   : > { %v325_v12 = vrot.slane %v324_v8, 2  ;;  %v319_v17 = vadd.f32 %v318_v11, %v317_v7 }
  0x58   : > { %v326_v18 = vadd.f32 %v325_v12, %v324_v8  ;;  %v320_v21 = vrot.slane %v319_v17, 1 }
  0x5a   : > { %v621_v26 = vpop.eup %620  ;;  %v327_v22 = vrot.slane %v326_v18, 1 }
  0x5b   : > { %v274_v30 = vcombine.high %v621_v26, %v621_v26  ;;  %v276_v31 = vsel %vm251_vm1, %v621_v26, 0.0  ;;  %v329_v44 = vsel %vm916_vm2, %v621_v26, 0.0 }
  0x5c   : > { %v277_v35 = vrot.slane %v276_v31, 4  ;;  %v331_v47 = vsel %vm251_vm1, %v329_v44, 0.0 }
  0x5d   : > { %v283_v34 = vsel %vm251_vm1, %v274_v30, 0.0  ;;  %v330_v45 = vsel %vm921_vm3, %v274_v30, 0.0  ;;  %v332_v52 = vrot.slane %v331_v47, 4  ;;  %v321_v30 = vadd.f32 %v320_v21, %v319_v17 }
  0x5e   : > { %v284_v36 = vrot.slane %v283_v34, 4  ;;  %v278_v39 = vadd.f32 %v277_v35, %v276_v31  ;;  %v338_v48 = vsel %vm251_vm1, %v330_v45, 0.0  ;;  %v328_v31 = vadd.f32 %v327_v22, %v326_v18 }
  0x5f   : > { %v339_v53 = vrot.slane %v338_v48, 4  ;;  %v333_v58 = vadd.f32 %v332_v52, %v331_v47 }
  0x60   : > { %v285_v40 = vadd.f32 %v284_v36, %v283_v34  ;;  %v279_v43 = vrot.slane %v278_v39, 2 }
  0x61   : > { %v340_v59 = vadd.f32 %v339_v53, %v338_v48  ;;  %v334_v0 = vrot.slane %v333_v58, 2 }
  0x62   : > { %v286_v46 = vrot.slane %v285_v40, 2  ;;  %v280_v49 = vadd.f32 %v279_v43, %v278_v39 }
  0x63   : > { %v341_v1 = vrot.slane %v340_v59, 2  ;;  %v335_v5 = vadd.f32 %v334_v0, %v333_v58 }
  0x64   : > { %v287_v50 = vadd.f32 %v286_v46, %v285_v40  ;;  %v281_v54 = vrot.slane %v280_v49, 1  ;;  %v747_v46 = vmov 1966171168  }
  0x65   : > { %v342_v6 = vadd.f32 %v341_v1, %v340_v59  ;;  %v336_v9 = vrot.slane %v335_v5, 1  ;;  %v392_v47 = vunpack.c.l.s4 %v747_v46 }
  0x66   : > { %v288_v55 = vrot.slane %v287_v50, 1  ;;  %v282_v60 = vadd.f32 %v281_v54, %v280_v49 }
  0x67   : > { %v343_v10 = vrot.slane %v342_v6, 1  ;;  %v337_v14 = vadd.f32 %v336_v9, %v335_v5  ;;  %v393_v54 = vunpack.c.0.s8 %v392_v47 }
  0x68   : > { %v289_v61 = vadd.f32 %v288_v55, %v287_v50  ;;  %622 = vrcp.f32 %v282_v60 }
  0x69   : > { %v344_v15 = vadd.f32 %v343_v10, %v342_v6  ;;  %v423_v6 = vsub.s32 1, %v904_v24 }
  0x6a   : > { %624 = vrcp.f32 %v289_v61 }
  0x6b   : > { %626 = vlog2.f32 %v282_v60 }
  0x6c   : > { %628 = vlog2.f32 %v289_v61  ;;  %v396_v61 = vsub.s32 %v393_v54, %v904_v24 }
  0x72   : > { %v623_v13 = vpop.eup %622 }
  0x73   : > { %v374_v19 = vmul.f32 %v623_v13, %v337_v14 }
  0x74   : > { %v625_v16 = vpop.eup %624 }
  0x75   : > { %v376_v20 = vmul.f32 %v625_v16, %v344_v15  ;;  %v627_v23 = vpop.eup %626  ;;  %v377_v26 = vsub.f32 1.0, %v374_v19 }
  0x76   : > { %v629_v25 = vpop.eup %628  ;;  %v368_v36 = vmul.f32 0.6931472, %v627_v23 }
  0x77   : > { %v378_v28 = vsub.f32 1.0, %v376_v20  ;;  %v370_v37 = vmul.f32 0.6931472, %v629_v25  ;;  %v379_v40 = vmax.f32 %v377_v26, 0.0 }
  0x78   : > { %v371_v48 = vsub.f32 %v321_v30, %v368_v36 }
  0x79   : > { %v380_v43 = vmax.f32 %v378_v28, 0.0  ;;  %v372_v41 = vsub.f32 %v328_v31, %v370_v37  ;;  %v381_v42 = vmul.f32 %v379_v40, %v379_v40 }
  0x7b   : > { %v382_v51 = vmul.f32 %v380_v43, %v380_v43  ;;  %v383_v57 = vmul.f32 %v381_v42, %v371_v48 }
  0x7d   : > { %v384_v58 = vmul.f32 %v382_v51, %v372_v41 }
  0xba   : > { %v349_v29 = vpop.permute.xlu0 %348 }
  0xbb   : > { %v351_v32 = vsel %vm916_vm2, %v349_v29, 0.0  ;;  %v352_v33 = vsel %vm921_vm3, %v349_v29, 0.0 }
  0xbc   : > { %v353_v34 = vsel %vm251_vm1, %v351_v32, 0.0  ;;  %v360_v35 = vsel %vm251_vm1, %v352_v33, 0.0 }
  0xbd   : > { %v354_v38 = vrot.slane %v353_v34, 4  ;;  %v361_v39 = vrot.slane %v360_v35, 4 }
  0xbf   : > { %v355_v44 = vadd.f32 %v354_v38, %v353_v34  ;;  %v362_v45 = vadd.f32 %v361_v39, %v360_v35 }
  0xc1   : > { %v356_v49 = vrot.slane %v355_v44, 2  ;;  %v363_v50 = vrot.slane %v362_v45, 2 }
  0xc3   : > { %v357_v52 = vadd.f32 %v356_v49, %v355_v44  ;;  %v364_v53 = vadd.f32 %v363_v50, %v362_v45 }
  0xc5   : > { %v358_v55 = vrot.slane %v357_v52, 1  ;;  %v365_v56 = vrot.slane %v364_v53, 1 }
  0xc7   : > { %v359_v59 = vadd.f32 %v358_v55, %v357_v52  ;;  %v366_v60 = vadd.f32 %v365_v56, %v364_v53 }
  0xc9   : > { %v385_v62 = vmul.f32 %v383_v57, %v359_v59  ;;  %v386_v63 = vmul.f32 %v384_v58, %v366_v60 }
  0xcb   : > { %v390_v0 = vcombine.low %v385_v62, %v386_v63 }
  0xcd   : > { %v397_v1 = vrot.slane %v390_v0, %v396_v61 }
  0xcf   : > { %v404_v4 = vrot.slane %v397_v1, %v396_v61 }
  0xd1   : > { %v406_v5 = vadd.f32 %v404_v4, %v387_v3 }
  0xd3   : > { %411 = vst.msk [vmem:[#allocation2] sm:$0x3] %vm888_vm0, %v406_v5 }
  0xda   : > { %v415_v7 = vld [vmem:[#allocation2] sm:$0x3] }
  0xdb   : > { %v420_v8 = vrot.slane %v415_v7, %v907_v27  ;;  %v424_v9 = vrot.slane %v415_v7, %v423_v6 }
  0xdd   : > { %v428_v10 = vsel %vm427_vm4, %v420_v8, 0.0  ;;  %v429_v11 = vsel %vm427_vm4, %v424_v9, 0.0 }
  0xde   : > { %v430_v12 = vadd.f32 %v429_v11, %v428_v10 }
  0xe0   : > { %431 = vadd.xlane.f32.xlu0 %v430_v12 }
 0x16d   : > { %v432_v2 = vpop.xlane.xlu0 %431 }
 0x16e   : > { %433 = vst [vmem:[%s225_s22] sm:$0x1] %v432_v2 }
 0x16f   : > { %673 = shalt.err (!%p670_p4)
}
 0x170   : > { %s674_s5 = scalar_lea.hbm %s955_s4, 16  ;;  %s678_s9 = scalar_lea.hbm %s1005_s3, 32 }
 0x171   : > { %p675_p10 = scmp.ne.s32.totalorder %s955_s4, %s674_s5  ;;  %p679_p2 = scmp.lt.u32.totalorder %s955_s4, %s1005_s3 }
 0x172   : > { %p680_p5 = scmp.lt.u32.totalorder %s678_s9, %s674_s5  ;;  %p682_p9 = scmp.lt.u32.totalorder %s674_s5, %s955_s4 }
 0x173   : > { %p676_p12 = pnand %p675_p10, %p1020_p11 }
 0x174   : > { %p681_p8 = por %p680_p5, %p679_p2 }
 0x175   : > { %p677_p1 = pneg %p676_p12 }
 0x176   : > { %p683_p0 = por %p682_p9, %p681_p8 }
 0x178   : > { %p684_p7 = pnand %p683_p0, %p677_p1 }
 0x17a   : > { %687 = shalt.err (!%p684_p7)
}
 0x17b   : > { %555 = dma.vmem_to_hbm [thread:$0]  (%p1020_p11), %s950_s23, 16, %s955_s4, %s435_s7  }
 0x17c PF: > { %s459_s21 = sand.u32 1, %s722_s12   ;;  %p1021_p13 = scmp.ne.s32.totalorder %s1010_s27, 0 }
 0x17d   : > { %p1022_p3 = scmp.ge.s32.totalorder %s742_s17, 2  ;;  %s460_s22 = scalar_lea.sflag [#allocation5], %s459_s21 }
 0x17f   : > { %p562_p6 = pnand %p1022_p3, %p1021_p13 }
 0x181   : > { %717 = dma.done.wait (!%p562_p6), %s460_s22, 16  }
 0x182   : > { %719 = vsyncadd (!%p562_p6), %s460_s22, 4294967280  ;;  %s19_s17 = sadd.s32 1, %s742_s17   ;;  %s1023_s12 = smov %s726_s13 }
 0x183   : > { %p16_p4 = scmp.ge.s32.totalorder %s19_s17, 4   ;;  %s1024_s13 = smov %s730_s14 }
 0x184   : > { %s1025_s14 = smov %s825_s26  ;;  %s1026_s15 = smov %s738_s16 }
 0x185   : > { %s1027_s16 = smov %s1029_s20  ;;  %18 = sbr.rel (!%p16_p4) target bundleno = 6 (0x6), region = 88 }
 0x18c   :  { %464 = vsyncpa [#allocation4], 1 }
 0x18d   :  { %466 = vsyncpa [#allocation4 + $0x1], 1 }
 0x18e   :  { %467 = vsyncpa [#allocation5], 1 }
 0x18f   :  { %469 = vsyncpa [#allocation5 + $0x1], 1 }

</bundles_post_ra>
